<compile_context>
chip_gen: v7x
topology: tpu7x:2x2x1
jax: 0.10.0
libtpu: 0.0.40
codegen_flags: <defaults>
</compile_context>

<pallas_src>
import functools
import math

import jax
import jax.numpy as jnp
from jax.experimental import pallas as pl
from jax.experimental.pallas import tpu as pltpu


def _gaussian_net_kernel(x_ref, w1_ref, b1_ref, w2_ref, b2_ref,
                         wh_ref, bh_ref, out_ref, *, action_dim):
    bf16 = jnp.bfloat16
    x = x_ref[...]

    # Layer 1: Linear + ReLU (bf16 MXU inputs, f32 accumulate/elementwise)
    h1 = jnp.dot(x.astype(bf16), w1_ref[...],
                 preferred_element_type=jnp.float32) + b1_ref[...]
    h1 = jnp.maximum(h1, 0.0)

    # Layer 2: Linear + ReLU
    h2 = jnp.dot(h1.astype(bf16), w2_ref[...],
                 preferred_element_type=jnp.float32) + b2_ref[...]
    h2 = jnp.maximum(h2, 0.0)

    # Fused heads: cols [0, action_dim) = mean, [action_dim, 2*ad) = log_std.
    heads = jnp.dot(h2.astype(bf16), wh_ref[...],
                    preferred_element_type=jnp.float32) + bh_ref[...]

    # std = exp(clamp(log_std, -20, 2)) only on the log_std columns.
    col = jax.lax.broadcasted_iota(jnp.int32, heads.shape, 1)
    std_all = jnp.exp(jnp.clip(heads, -20.0, 2.0))
    out_ref[...] = jnp.where(col >= action_dim, std_all, heads)


def gaussian_network_forward(x, kparams, *, action_dim):
    """Pallas forward pass. kparams from prepare_kernel_params. Returns (mean, std)."""
    w1, b1, w2, b2, wh, bh = kparams
    batch, input_dim = x.shape
    hidden = w1.shape[1]
    head_pad = wh.shape[1]

    # Batch tiling: single tile at small batch; 512-row tiles (>=85% of HBM
    # roofline per reference data) when the batch is large.
    tb = batch if batch <= 512 else 512
    nb = pl.cdiv(batch, tb)

    out = pl.pallas_call(
        functools.partial(_gaussian_net_kernel, action_dim=action_dim),
        out_shape=jax.ShapeDtypeStruct((batch, head_pad), jnp.float32),
        grid=(nb,),
        in_specs=[
            pl.BlockSpec((tb, input_dim), lambda i: (i, 0)),
            pl.BlockSpec((input_dim, hidden), lambda i: (0, 0)),
            pl.BlockSpec((1, hidden), lambda i: (0, 0)),
            pl.BlockSpec((hidden, hidden), lambda i: (0, 0)),
            pl.BlockSpec((1, hidden), lambda i: (0, 0)),
            pl.BlockSpec((hidden, head_pad), lambda i: (0, 0)),
            pl.BlockSpec((1, head_pad), lambda i: (0, 0)),
        ],
        out_specs=pl.BlockSpec((tb, head_pad), lambda i: (i, 0)),
        compiler_params=pltpu.CompilerParams(
            dimension_semantics=("parallel",)),
    )(x, w1, b1, w2, b2, wh, bh)

    mean = out[:, :action_dim]
    std = out[:, action_dim:2 * action_dim]
    return mean, std


def init_params(key, input_dim, action_dim, hidden_units):
    """Xavier-uniform weights, zero biases (matches init_weights), f32."""
    def xavier(k, fan_in, fan_out):
        bound = math.sqrt(6.0 / (fan_in + fan_out))
        return jax.random.uniform(k, (fan_in, fan_out), jnp.float32,
                                  minval=-bound, maxval=bound)

    k1, k2, k3, k4 = jax.random.split(key, 4)
    w1 = xavier(k1, input_dim, hidden_units)
    b1 = jnp.zeros((1, hidden_units), jnp.float32)
    w2 = xavier(k2, hidden_units, hidden_units)
    b2 = jnp.zeros((1, hidden_units), jnp.float32)
    wm = xavier(k3, hidden_units, action_dim)
    bm = jnp.zeros((1, action_dim), jnp.float32)
    ws = xavier(k4, hidden_units, action_dim)
    bs = jnp.zeros((1, action_dim), jnp.float32)
    return (w1, b1, w2, b2, wm, bm, ws, bs)


def prepare_kernel_params(params, action_dim):
    """Fuse mean/log_std heads, pad heads to a 128-lane-dense slab, cast weights to bf16."""
    w1, b1, w2, b2, wm, bm, ws, bs = params
    hidden = w1.shape[1]
    head_pad = 128 * pl.cdiv(2 * action_dim, 128)

    wh = jnp.zeros((hidden, head_pad), jnp.float32)
    wh = wh.at[:, :action_dim].set(wm)
    wh = wh.at[:, action_dim:2 * action_dim].set(ws)
    bh = jnp.zeros((1, head_pad), jnp.float32)
    bh = bh.at[:, :action_dim].set(bm)
    bh = bh.at[:, action_dim:2 * action_dim].set(bs)

    bf16 = jnp.bfloat16
    return (w1.astype(bf16), b1, w2.astype(bf16), b2, wh.astype(bf16), bh)


def reference_forward_f32(x, params):
    """Pure-JAX f32 reference (exact module semantics)."""
    w1, b1, w2, b2, wm, bm, ws, bs = params
    h = jnp.maximum(x @ w1 + b1, 0.0)
    h = jnp.maximum(h @ w2 + b2, 0.0)
    mean = h @ wm + bm
    log_std = jnp.clip(h @ ws + bs, -20.0, 2.0)
    return mean, jnp.exp(log_std)


def reference_forward_bf16(x, params):
    """Pure-JAX reference mimicking the kernel's bf16-MXU / f32-accumulate precision."""
    w1, b1, w2, b2, wm, bm, ws, bs = params
    bf = jnp.bfloat16

    def mm(a, w):
        return jnp.dot(a.astype(bf), w.astype(bf),
                       preferred_element_type=jnp.float32)

    h = jnp.maximum(mm(x, w1) + b1, 0.0)
    h = jnp.maximum(mm(h, w2) + b2, 0.0)
    mean = mm(h, wm) + bm
    log_std = jnp.clip(mm(h, ws) + bs, -20.0, 2.0)
    return mean, jnp.exp(log_std)


if __name__ == "__main__":
    # Small shapes consistent with the module: flat state vector input.
    batch = 8
    input_dim = 32
    action_dim = 8
    hidden_units = 256
    max_action = 1.0  # not used in forward(); used only by sample()

    key = jax.random.PRNGKey(0)
    k_param, k_x = jax.random.split(key)
    params = init_params(k_param, input_dim, action_dim, hidden_units)
    kparams = prepare_kernel_params(params, action_dim)
    x = jax.random.normal(k_x, (batch, input_dim), jnp.float32)

    fwd = jax.jit(gaussian_network_forward, static_argnames=("action_dim",))
    mean, std = fwd(x, kparams, action_dim=action_dim)
    jax.block_until_ready((mean, std))

    # Sanity checks: tight vs precision-matched reference, loose vs f32 reference.
    mean_r16, std_r16 = reference_forward_bf16(x, params)
    mean_r32, std_r32 = reference_forward_f32(x, params)
    assert mean.shape == (batch, action_dim) and std.shape == (batch, action_dim)
    assert jnp.allclose(mean, mean_r16, atol=2e-3, rtol=2e-3)
    assert jnp.allclose(std, std_r16, atol=2e-3, rtol=2e-3)
    assert jnp.allclose(mean, mean_r32, atol=5e-2, rtol=5e-2)
    assert jnp.allclose(std, std_r32, atol=5e-2, rtol=5e-2)
    assert bool(jnp.all(std > 0.0))

    # TODO(synk): sample() uses Normal.rsample / tanh-squash log-prob; forward()
    # (the requested hot path) is fully implemented in the Pallas kernel.
    print("KERNEL_OK")
</pallas_src>

<mosaic_0001>
module attributes {stable_mosaic.version = 11 : i64} {
  func.func @_gaussian_net_kernel(%arg0: i32, %arg1: memref<8x32xf32, #tpu.memory_space<vmem>>, %arg2: memref<32x256xbf16, #tpu.memory_space<vmem>>, %arg3: memref<1x256xf32, #tpu.memory_space<vmem>>, %arg4: memref<256x256xbf16, #tpu.memory_space<vmem>>, %arg5: memref<1x256xf32, #tpu.memory_space<vmem>>, %arg6: memref<256x128xbf16, #tpu.memory_space<vmem>>, %arg7: memref<1x128xf32, #tpu.memory_space<vmem>>, %arg8: memref<8x128xf32, #tpu.memory_space<vmem>>) attributes {dimension_semantics = [#tpu.dimension_semantics<parallel>], iteration_bounds = array<i64: 1>, scalar_prefetch = 0 : i64, scratch_operands = 0 : i64, tpu.core_type = #tpu.core_type<tc>, window_params = [{transform_indices = @transform_0, window_bounds = array<i64: 8, 32>}, {pipeline_mode = #tpu.pipeline_mode<synchronous>, transform_indices = @transform_1, window_bounds = array<i64: 32, 256>}, {pipeline_mode = #tpu.pipeline_mode<synchronous>, transform_indices = @transform_2, window_bounds = array<i64: 1, 256>}, {pipeline_mode = #tpu.pipeline_mode<synchronous>, transform_indices = @transform_3, window_bounds = array<i64: 256, 256>}, {pipeline_mode = #tpu.pipeline_mode<synchronous>, transform_indices = @transform_4, window_bounds = array<i64: 1, 256>}, {pipeline_mode = #tpu.pipeline_mode<synchronous>, transform_indices = @transform_5, window_bounds = array<i64: 256, 128>}, {pipeline_mode = #tpu.pipeline_mode<synchronous>, transform_indices = @transform_6, window_bounds = array<i64: 1, 128>}, {transform_indices = @transform_7, window_bounds = array<i64: 8, 128>}]} {
    %c0 = arith.constant 0 : index
    %c0_0 = arith.constant 0 : index
    %0 = vector.load %arg1[%c0, %c0_0] : memref<8x32xf32, #tpu.memory_space<vmem>>, vector<8x32xf32>
    %1 = arith.truncf %0 : vector<8x32xf32> to vector<8x32xbf16>
    %c0_1 = arith.constant 0 : index
    %c0_2 = arith.constant 0 : index
    %2 = vector.load %arg2[%c0_1, %c0_2] : memref<32x256xbf16, #tpu.memory_space<vmem>>, vector<32x256xbf16>
    %cst = arith.constant dense<0.000000e+00> : vector<8x256xf32>
    %3 = tpu.matmul %1, %2, %cst {dimension_numbers = #tpu.dot_dimension_numbers<[1], [0], [0], [1], [0, 0, 1, 1], [], []>} : vector<8x32xbf16>, vector<32x256xbf16>, vector<8x256xf32> -> vector<8x256xf32>
    %c0_3 = arith.constant 0 : index
    %c0_4 = arith.constant 0 : index
    %4 = vector.load %arg3[%c0_3, %c0_4] : memref<1x256xf32, #tpu.memory_space<vmem>>, vector<1x256xf32>
    %5 = vector.broadcast %4 : vector<1x256xf32> to vector<8x256xf32>
    %6 = arith.addf %3, %5 : vector<8x256xf32>
    %cst_5 = arith.constant 0.000000e+00 : f32
    %7 = vector.broadcast %cst_5 : f32 to vector<8x256xf32>
    %8 = arith.maximumf %6, %7 : vector<8x256xf32>
    %9 = arith.truncf %8 : vector<8x256xf32> to vector<8x256xbf16>
    %c0_6 = arith.constant 0 : index
    %c0_7 = arith.constant 0 : index
    %10 = vector.load %arg4[%c0_6, %c0_7] : memref<256x256xbf16, #tpu.memory_space<vmem>>, vector<256x256xbf16>
    %cst_8 = arith.constant dense<0.000000e+00> : vector<8x256xf32>
    %11 = tpu.matmul %9, %10, %cst_8 {dimension_numbers = #tpu.dot_dimension_numbers<[1], [0], [0], [1], [0, 0, 1, 1], [], []>} : vector<8x256xbf16>, vector<256x256xbf16>, vector<8x256xf32> -> vector<8x256xf32>
    %c0_9 = arith.constant 0 : index
    %c0_10 = arith.constant 0 : index
    %12 = vector.load %arg5[%c0_9, %c0_10] : memref<1x256xf32, #tpu.memory_space<vmem>>, vector<1x256xf32>
    %13 = vector.broadcast %12 : vector<1x256xf32> to vector<8x256xf32>
    %14 = arith.addf %11, %13 : vector<8x256xf32>
    %cst_11 = arith.constant 0.000000e+00 : f32
    %15 = vector.broadcast %cst_11 : f32 to vector<8x256xf32>
    %16 = arith.maximumf %14, %15 : vector<8x256xf32>
    %17 = arith.truncf %16 : vector<8x256xf32> to vector<8x256xbf16>
    %c0_12 = arith.constant 0 : index
    %c0_13 = arith.constant 0 : index
    %18 = vector.load %arg6[%c0_12, %c0_13] : memref<256x128xbf16, #tpu.memory_space<vmem>>, vector<256x128xbf16>
    %cst_14 = arith.constant dense<0.000000e+00> : vector<8x128xf32>
    %19 = tpu.matmul %17, %18, %cst_14 {dimension_numbers = #tpu.dot_dimension_numbers<[1], [0], [0], [1], [0, 0, 1, 1], [], []>} : vector<8x256xbf16>, vector<256x128xbf16>, vector<8x128xf32> -> vector<8x128xf32>
    %c0_15 = arith.constant 0 : index
    %c0_16 = arith.constant 0 : index
    %20 = vector.load %arg7[%c0_15, %c0_16] : memref<1x128xf32, #tpu.memory_space<vmem>>, vector<1x128xf32>
    %21 = vector.broadcast %20 : vector<1x128xf32> to vector<8x128xf32>
    %22 = arith.addf %19, %21 : vector<8x128xf32>
    %23 = tpu.iota {dimensions = array<i32: 1>} : vector<8x128xi32>
    %cst_17 = arith.constant -2.000000e+01 : f32
    %cst_18 = arith.constant 2.000000e+00 : f32
    %24 = vector.broadcast %cst_17 : f32 to vector<8x128xf32>
    %25 = arith.maximumf %24, %22 : vector<8x128xf32>
    %26 = vector.broadcast %cst_18 : f32 to vector<8x128xf32>
    %27 = arith.minimumf %26, %25 : vector<8x128xf32>
    %28 = math.exp %27 : vector<8x128xf32>
    %c8_i32 = arith.constant 8 : i32
    %29 = vector.broadcast %c8_i32 : i32 to vector<8x128xi32>
    %30 = arith.cmpi sge, %23, %29 : vector<8x128xi32>
    %31 = arith.select %30, %28, %22 : vector<8x128xi1>, vector<8x128xf32>
    %c0_19 = arith.constant 0 : index
    %c0_20 = arith.constant 0 : index
    %32 = vector.load %arg8[%c0_19, %c0_20] : memref<8x128xf32, #tpu.memory_space<vmem>>, vector<8x128xf32>
    tpu.vector_store %arg8[%c0_19, %c0_20], %31 {strides = array<i32>} : memref<8x128xf32, #tpu.memory_space<vmem>>, vector<8x128xf32>,
    return
  }
  func.func @transform_0(%arg0: i32) -> (i32, i32) {
    %c0_i32 = arith.constant 0 : i32
    %c0_i32_0 = arith.constant 0 : i32
    return %arg0, %c0_i32 : i32, i32
  }
  func.func @transform_1(%arg0: i32) -> (i32, i32) {
    %c0_i32 = arith.constant 0 : i32
    %c0_i32_0 = arith.constant 0 : i32
    %c0_i32_1 = arith.constant 0 : i32
    return %c0_i32, %c0_i32_0 : i32, i32
  }
  func.func @transform_2(%arg0: i32) -> (i32, i32) {
    %c0_i32 = arith.constant 0 : i32
    %c0_i32_0 = arith.constant 0 : i32
    %c0_i32_1 = arith.constant 0 : i32
    return %c0_i32, %c0_i32_0 : i32, i32
  }
  func.func @transform_3(%arg0: i32) -> (i32, i32) {
    %c0_i32 = arith.constant 0 : i32
    %c0_i32_0 = arith.constant 0 : i32
    %c0_i32_1 = arith.constant 0 : i32
    return %c0_i32, %c0_i32_0 : i32, i32
  }
  func.func @transform_4(%arg0: i32) -> (i32, i32) {
    %c0_i32 = arith.constant 0 : i32
    %c0_i32_0 = arith.constant 0 : i32
    %c0_i32_1 = arith.constant 0 : i32
    return %c0_i32, %c0_i32_0 : i32, i32
  }
  func.func @transform_5(%arg0: i32) -> (i32, i32) {
    %c0_i32 = arith.constant 0 : i32
    %c0_i32_0 = arith.constant 0 : i32
    %c0_i32_1 = arith.constant 0 : i32
    return %c0_i32, %c0_i32_0 : i32, i32
  }
  func.func @transform_6(%arg0: i32) -> (i32, i32) {
    %c0_i32 = arith.constant 0 : i32
    %c0_i32_0 = arith.constant 0 : i32
    %c0_i32_1 = arith.constant 0 : i32
    return %c0_i32, %c0_i32_0 : i32, i32
  }
  func.func @transform_7(%arg0: i32) -> (i32, i32) {
    %c0_i32 = arith.constant 0 : i32
    %c0_i32_0 = arith.constant 0 : i32
    return %arg0, %c0_i32 : i32, i32
  }
}

</mosaic_0001>

<bundles_post_ra>
// kernel: gaussian_network_forward.1
= control target key start
LH: loop header
LB: loop body
LE: loop exit
PB: predicated region body
PF: predicated region fallthrough
CT: control target
= control target key end

     0   :  { %12 = vsyncpa [#allocation3], 0  ;;  %s973_s0 = inlined_call_operand.hbm [shape: f32[8,32], index: 0, kind: input, shape index: {}]   ;;  %s974_s1 = inlined_call_operand.hbm [shape: bf16[32,256], index: 1, kind: input, shape index: {}]   ;;  %s975_s2 = inlined_call_operand.vmem [shape: f32[1,256], index: 2, kind: input, shape index: {}]   ;;  %s976_s3 = inlined_call_operand.hbm [shape: bf16[256,256], index: 3, kind: input, shape index: {}]   ;;  %s977_s4 = inlined_call_operand.vmem [shape: f32[1,256], index: 4, kind: input, shape index: {}]   ;;  %s978_s5 = inlined_call_operand.hbm [shape: bf16[256,128], index: 5, kind: input, shape index: {}]   ;;  %s979_s6 = inlined_call_operand.vmem [shape: f32[1,128], index: 6, kind: input, shape index: {}]   ;;  %s980_s7 = inlined_call_operand.vmem [shape: f32[8,128], index: 7, kind: output, shape index: {}]  }
   0x1   :  { %13 = vsyncpa [#allocation5], 0 }
   0x2   :  { %14 = vsyncpa [#allocation8], 0  ;;  %s858_s24 = smov [#allocation4]   ;;  %s764_s28 = scalar_lea.hbm %s974_s1, 512 }
   0x3   :  { %s30_s25 = sshll.u32 %s858_s24, 4  ;;  %p765_p0 = scmp.ne.s32.totalorder %s974_s1, %s764_s28  ;;  %s31_s25 = int_to_ptr.vmem [resolvable:$true] %s30_s25 }
   0x4   :  { %p768_p1 = scmp.lt.u32.totalorder %s764_s28, %s974_s1 }
   0x6   :  { %p770_p2 = pnand %p768_p1, %p765_p0 }
   0x8   :  { %773 = shalt.err (!%p770_p2)
}
   0x9   :  { %s774_s10 = scalar_lea.vmem %s31_s25, 512  ;;  %p779_p4 = scmp.lt.s32.totalorder %s31_s25, %s31_s25 }
   0xa   :  { %p775_p3 = scmp.ne.s32.totalorder %s31_s25, %s774_s10  ;;  %p780_p5 = scmp.lt.s32.totalorder %s774_s10, %s774_s10 }
   0xc   :  { %p781_p6 = por %p780_p5, %p779_p4 }
   0xe   :  { %p782_p7 = pnand %p781_p6, %p775_p3 }
  0x10   :  { %785 = shalt.err (!%p782_p7)
}
  0x11   :  { %s859_s11 = smov 128   ;;  %s860_s12 = smov 8  }
  0x12   :  { %36 = dma.hbm_to_vmem [thread:$0]  %s974_s1, 512, %s31_s25, [#allocation5], %s859_s11, %s859_s11, %s860_s12  }
  0x13   :  { %s861_s15 = smov [#allocation2]   ;;  %s862_s17 = smov [#allocation6]  }
  0x14   :  { %s21_s16 = sshll.u32 %s861_s15, 4  ;;  %s44_s18 = sshll.u32 %s862_s17, 4  ;;  %s22_s16 = int_to_ptr.vmem [resolvable:$true] %s21_s16  ;;  %s45_s18 = int_to_ptr.vmem [resolvable:$true] %s44_s18 }
  0x15   :  { %s786_s21 = scalar_lea.hbm %s973_s0, 128 }
  0x16   :  { %p787_p8 = scmp.ne.s32.totalorder %s973_s0, %s786_s21  ;;  %p790_p9 = scmp.lt.u32.totalorder %s786_s21, %s973_s0 }
  0x18   :  { %p792_p10 = pnand %p790_p9, %p787_p8 }
  0x1a   :  { %795 = shalt.err (!%p792_p10)
}
  0x1b   :  { %s796_s1 = scalar_lea.vmem %s22_s16, 128  ;;  %p801_p12 = scmp.lt.s32.totalorder %s22_s16, %s22_s16 }
  0x1c   :  { %p797_p11 = scmp.ne.s32.totalorder %s22_s16, %s796_s1  ;;  %p802_p13 = scmp.lt.s32.totalorder %s796_s1, %s796_s1 }
  0x1e   :  { %p803_p0 = por %p802_p13, %p801_p12 }
  0x20   :  { %p804_p1 = pnand %p803_p0, %p797_p11 }
  0x22   :  { %807 = shalt.err (!%p804_p1)
}
  0x23   :  { %24 = dma.hbm_to_vmem [thread:$0]  %s973_s0, 128, %s22_s16, [#allocation3]  }
  0x24   :  { %s808_s30 = scalar_lea.hbm %s976_s3, 4096 }
  0x25   :  { %p809_p2 = scmp.ne.s32.totalorder %s976_s3, %s808_s30  ;;  %p812_p3 = scmp.lt.u32.totalorder %s808_s30, %s976_s3 }
  0x27   :  { %p814_p4 = pnand %p812_p3, %p809_p2 }
  0x29   :  { %817 = shalt.err (!%p814_p4)
}
  0x2a   :  { %s818_s14 = scalar_lea.vmem %s45_s18, 4096  ;;  %p823_p6 = scmp.lt.s32.totalorder %s45_s18, %s45_s18 }
  0x2b   :  { %p819_p5 = scmp.ne.s32.totalorder %s45_s18, %s818_s14  ;;  %p824_p7 = scmp.lt.s32.totalorder %s818_s14, %s818_s14 }
  0x2d   :  { %p825_p8 = por %p824_p7, %p823_p6 }
  0x2f   :  { %p826_p9 = pnand %p825_p8, %p819_p5 }
  0x31   :  { %829 = shalt.err (!%p826_p9)
}
  0x32   :  { %50 = dma.hbm_to_vmem [thread:$0]  %s976_s3, 4096, %s45_s18, [#allocation5], %s859_s11, %s859_s11, %s860_s12  }
  0x33   :  { %s863_s16 = smov [#allocation7]   ;;  %s830_s21 = scalar_lea.hbm %s978_s5, 2048 }
  0x34   :  { %s58_s17 = sshll.u32 %s863_s16, 4  ;;  %p831_p10 = scmp.ne.s32.totalorder %s978_s5, %s830_s21  ;;  %s59_s17 = int_to_ptr.vmem [resolvable:$true] %s58_s17 }
  0x35   :  { %p834_p11 = scmp.lt.u32.totalorder %s830_s21, %s978_s5 }
  0x37   :  { %p836_p12 = pnand %p834_p11, %p831_p10 }
  0x39   :  { %839 = shalt.err (!%p836_p12)
}
  0x3a   :  { %s840_s1 = scalar_lea.vmem %s59_s17, 2048  ;;  %p845_p0 = scmp.lt.s32.totalorder %s59_s17, %s59_s17 }
  0x3b   :  { %p841_p13 = scmp.ne.s32.totalorder %s59_s17, %s840_s1  ;;  %p846_p1 = scmp.lt.s32.totalorder %s840_s1, %s840_s1 }
  0x3d   :  { %p847_p2 = por %p846_p1, %p845_p0 }
  0x3f   :  { %p848_p3 = pnand %p847_p2, %p841_p13 }
  0x41   :  { %851 = shalt.err (!%p848_p3)
}
  0x42   :  { %s864_s3 = smov 64   ;;  %s865_s11 = smov 4  }
  0x43   :  { %64 = dma.hbm_to_vmem [thread:$0]  %s978_s5, 2048, %s59_s17, [#allocation8], %s864_s3, %s864_s3, %s865_s11  }
  0x44   :  { %852 = dma.done.wait [#allocation3], 128  }
  0x45   :  { %853 = vsyncadd [#allocation3], 4294967168 }
  0x46   :  { %854 = dma.done.wait [#allocation5], 4608  }
  0x47   :  { %855 = vsyncadd [#allocation5], 4294962688 }
  0x48   :  { %856 = dma.done.wait [#allocation8], 2048  }
  0x49   :  { %857 = vsyncadd [#allocation8], 4294965248  ;;  %v866_v0 = vmov 0   ;;  %v692_v1 = vld [vmem:[#allocation4 + $0x4] ss:$8 sps:$4 sm:$0xff]   ;;  %v80_v5 = vld [vmem:[#allocation2] sm:$0xff]  ;;  %v88_v51 = vlaneseq }
  0x4a   :  { %154 = vmatprep.mubr.bf16.mxu0 %v866_v0  ;;  %v694_v2 = vld [vmem:[#allocation4] ss:$8 sps:$4 sm:$0xff]   ;;  %122 = vmatprep.subr.bf16.mxu0 %v692_v1  ;;  %v695_v3 = vld [vmem:[#allocation4 + $0x14] ss:$8 sps:$4 sm:$0xff]   ;;  %v697_v4 = vld [vmem:[#allocation4 + $0x10] ss:$8 sps:$4 sm:$0xff]   ;;  %v81_v9 = vpack.c.bf16 %v80_v5, %v80_v5 }
  0x4b   :  { %123 = vmatpush1.bf16.msra.mxu0 %v694_v2  ;;  %v698_v6 = vld [vmem:[#allocation6 + $0x4] ss:$8 sps:$4 sm:$0xff]   ;;  %v700_v7 = vld [vmem:[#allocation6] ss:$8 sps:$4 sm:$0xff]   ;;  %v701_v8 = vld [vmem:[#allocation6 + $0x14] ss:$8 sps:$4 sm:$0xff]  }
  0x4c   :  { %124 = vmatprep.subr.bf16.mxu0 %v695_v3  ;;  %371 = vmatprep.subr.bf16.mxu1 %v698_v6  ;;  %v703_v10 = vld [vmem:[#allocation6 + $0x10] ss:$8 sps:$4 sm:$0xff]   ;;  %vm118_vm0 = vcmask 261120   ;;  %v704_v11 = vld [vmem:[#allocation6 + $0x24] ss:$8 sps:$4 sm:$0xff]   ;;  %v89_v52 = vshrl.u32 %v88_v51, 7 }
  0x4d   :  { %372 = vmatpush1.bf16.msra.mxu1 %v700_v7  ;;  %v706_v12 = vld [vmem:[#allocation6 + $0x20] ss:$8 sps:$4 sm:$0xff]   ;;  %v707_v13 = vld [vmem:[#allocation6 + $0x34] ss:$8 sps:$4 sm:$0xff]   ;;  %v709_v14 = vld [vmem:[#allocation6 + $0x30] ss:$8 sps:$4 sm:$0xff]  }
  0x4e   :  { %373 = vmatprep.subr.bf16.mxu1 %v701_v8  ;;  %v710_v15 = vld [vmem:[#allocation6 + $0x44] ss:$8 sps:$4 sm:$0xff]   ;;  %v712_v16 = vld [vmem:[#allocation6 + $0x40] ss:$8 sps:$4 sm:$0xff]   ;;  %v713_v17 = vld [vmem:[#allocation6 + $0x54] ss:$8 sps:$4 sm:$0xff]  }
  0x4f   :  { %125 = vmatpush1.bf16.msra.mxu0 %v697_v4  ;;  %v715_v18 = vld [vmem:[#allocation6 + $0x50] ss:$8 sps:$4 sm:$0xff]   ;;  %v716_v19 = vld [vmem:[#allocation6 + $0x64] ss:$8 sps:$4 sm:$0xff]   ;;  %v718_v20 = vld [vmem:[#allocation6 + $0x60] ss:$8 sps:$4 sm:$0xff]  }
  0x50   :  { %v719_v21 = vld [vmem:[#allocation6 + $0x74] ss:$8 sps:$4 sm:$0xff]   ;;  %v721_v22 = vld [vmem:[#allocation6 + $0x70] ss:$8 sps:$4 sm:$0xff]   ;;  %v722_v23 = vld [vmem:[#allocation6 + $0x84] ss:$8 sps:$4 sm:$0xff]  }
  0x51   :  { %374 = vmatpush1.bf16.msra.mxu1 %v703_v10  ;;  %v724_v24 = vld [vmem:[#allocation6 + $0x80] ss:$8 sps:$4 sm:$0xff]   ;;  %v725_v25 = vld [vmem:[#allocation6 + $0x94] ss:$8 sps:$4 sm:$0xff]   ;;  %v727_v26 = vld [vmem:[#allocation6 + $0x90] ss:$8 sps:$4 sm:$0xff]  }
  0x52   :  { %611 = vmatmul.mubr.msk.bf16.vlgmr.msra.gmra.mrb[0].mxu0 %vm118_vm0, %v81_v9  ;;  %375 = vmatprep.subr.bf16.mxu1 %v704_v11  ;;  %v728_v27 = vld [vmem:[#allocation6 + $0xa4] ss:$8 sps:$4 sm:$0xff]   ;;  %v730_v28 = vld [vmem:[#allocation6 + $0xa0] ss:$8 sps:$4 sm:$0xff]   ;;  %v731_v29 = vld [vmem:[#allocation6 + $0xb4] ss:$8 sps:$4 sm:$0xff]  }
  0x53   :  { %v733_v30 = vld [vmem:[#allocation6 + $0xb0] ss:$8 sps:$4 sm:$0xff]   ;;  %v734_v31 = vld [vmem:[#allocation6 + $0xc4] ss:$8 sps:$4 sm:$0xff]   ;;  %v736_v32 = vld [vmem:[#allocation6 + $0xc0] ss:$8 sps:$4 sm:$0xff]  }
  0x54   :  { %v737_v33 = vld [vmem:[#allocation6 + $0xd4] ss:$8 sps:$4 sm:$0xff]   ;;  %v739_v34 = vld [vmem:[#allocation6 + $0xd0] ss:$8 sps:$4 sm:$0xff]   ;;  %v740_v35 = vld [vmem:[#allocation6 + $0xe4] ss:$8 sps:$4 sm:$0xff]  }
  0x55   :  { %376 = vmatpush1.bf16.msra.mxu1 %v706_v12  ;;  %v742_v36 = vld [vmem:[#allocation6 + $0xe0] ss:$8 sps:$4 sm:$0xff]   ;;  %v743_v37 = vld [vmem:[#allocation6 + $0xf4] ss:$8 sps:$4 sm:$0xff]   ;;  %v745_v38 = vld [vmem:[#allocation6 + $0xf0] ss:$8 sps:$4 sm:$0xff]  }
  0x56   :  { %377 = vmatprep.subr.bf16.mxu1 %v707_v13  ;;  %v746_v39 = vld [vmem:[#allocation7 + $0x40] sm:$0xff]   ;;  %v748_v41 = vld [vmem:[#allocation7 + $0x48] sm:$0xff]   ;;  %v750_v43 = vld [vmem:[#allocation7 + $0x50] sm:$0xff]   ;;  %v90_v53 = vsub.s32 0, %v89_v52  ;;  %v94_v55 = vsub.s32 1, %v89_v52 }
  0x57   :  { %v747_v40 = vld [vmem:[#allocation7] sm:$0xff]   ;;  %661 = vmatprep.subr.bf16.mxu0 %v746_v39  ;;  %v749_v42 = vld [vmem:[#allocation7 + $0x8] sm:$0xff]   ;;  %v751_v44 = vld [vmem:[#allocation7 + $0x10] sm:$0xff]  }
  0x58   :  { %662 = vmatpush3.bf16.msra.mxu0 %v747_v40  ;;  %v752_v45 = vld [vmem:[#allocation7 + $0x58] sm:$0xff]   ;;  %v754_v47 = vld [vmem:[#allocation7 + $0x60] sm:$0xff]   ;;  %v756_v49 = vld [vmem:[#allocation7 + $0x68] sm:$0xff]  }
  0x59   :  { %378 = vmatpush1.bf16.msra.mxu1 %v709_v14  ;;  %663 = vmatprep.subr.bf16.mxu0 %v748_v41  ;;  %v753_v46 = vld [vmem:[#allocation7 + $0x18] sm:$0xff]   ;;  %v755_v48 = vld [vmem:[#allocation7 + $0x20] sm:$0xff]   ;;  %v757_v50 = vld [vmem:[#allocation7 + $0x28] sm:$0xff]  }
  0x5a   :  { %379 = vmatprep.subr.bf16.mxu1 %v710_v15  ;;  %v86_v54 = vld [vmem:[%s975_s2] sm:$0x3]  ;;  %v760_v6 = vld [vmem:[#allocation7 + $0x78] sm:$0xff]  }
  0x5b   :  { %v91_v56 = vrot.slane %v86_v54, %v90_v53  ;;  %v95_v57 = vrot.slane %v86_v54, %v94_v55  ;;  %v758_v4 = vld [vmem:[#allocation7 + $0x70] sm:$0xff]   ;;  %v761_v7 = vld [vmem:[#allocation7 + $0x38] sm:$0xff]  }
  0x5c   :  { %664 = vmatpush3.bf16.msra.mxu0 %v749_v42  ;;  %v759_v5 = vld [vmem:[#allocation7 + $0x30] sm:$0xff]  }
  0x5d   :  { %380 = vmatpush1.bf16.msra.mxu1 %v712_v16  ;;  %665 = vmatprep.subr.bf16.mxu0 %v750_v43  ;;  %v199_v8 = vld [vmem:[%s977_s4] sm:$0x3] }
  0x5e   :  { %381 = vmatprep.subr.bf16.mxu1 %v713_v17  ;;  %v204_v9 = vrot.slane %v199_v8, %v90_v53  ;;  %v208_v10 = vrot.slane %v199_v8, %v94_v55 }
  0x60   :  { %666 = vmatpush3.bf16.msra.mxu0 %v751_v44 }
  0x61   :  { %382 = vmatpush1.bf16.msra.mxu1 %v715_v18  ;;  %667 = vmatprep.subr.bf16.mxu0 %v752_v45 }
  0x62   :  { %383 = vmatprep.subr.bf16.mxu1 %v716_v19 }
  0x64   :  { %668 = vmatpush3.bf16.msra.mxu0 %v753_v46 }
  0x65   :  { %384 = vmatpush1.bf16.msra.mxu1 %v718_v20  ;;  %669 = vmatprep.subr.bf16.mxu0 %v754_v47 }
  0x66   :  { %385 = vmatprep.subr.bf16.mxu1 %v719_v21 }
  0x68   :  { %670 = vmatpush3.bf16.msra.mxu0 %v755_v48 }
  0x69   :  { %386 = vmatpush1.bf16.msra.mxu1 %v721_v22  ;;  %671 = vmatprep.subr.bf16.mxu0 %v756_v49  ;;  %v644_v22 = vld [vmem:[%s979_s6] ss:$0 sm:$0xff] }
  0x6a   :  { %387 = vmatprep.subr.bf16.mxu1 %v722_v23 }
  0x6c   :  { %672 = vmatpush3.bf16.msra.mxu0 %v757_v50 }
  0x6d   :  { %388 = vmatpush1.bf16.msra.mxu1 %v724_v24  ;;  %673 = vmatprep.subr.bf16.mxu0 %v758_v4 }
  0x6e   :  { %389 = vmatprep.subr.bf16.mxu1 %v725_v25 }
  0x70   :  { %674 = vmatpush3.bf16.msra.mxu0 %v759_v5 }
  0x71   :  { %390 = vmatpush1.bf16.msra.mxu1 %v727_v26  ;;  %675 = vmatprep.subr.bf16.mxu0 %v760_v6 }
  0x72   :  { %391 = vmatprep.subr.bf16.mxu1 %v728_v27 }
  0x74   :  { %676 = vmatpush3.bf16.msra.mxu0 %v761_v7 }
  0x75   :  { %392 = vmatpush1.bf16.msra.mxu1 %v730_v28 }
  0x76   :  { %393 = vmatprep.subr.bf16.mxu1 %v731_v29 }
  0x79   :  { %394 = vmatpush1.bf16.msra.mxu1 %v733_v30 }
  0x7a   :  { %395 = vmatprep.subr.bf16.mxu1 %v734_v31  ;;  %v592_v31 = vand.u32 127, %v88_v51 }
  0x7c   :  { %vm597_vm1 = vcmp.ge.s32.totalorder %v592_v31, 8 }
  0x7d   :  { %396 = vmatpush1.bf16.msra.mxu1 %v736_v32 }
  0x7e   :  { %397 = vmatprep.subr.bf16.mxu1 %v737_v33 }
  0x81   :  { %398 = vmatpush1.bf16.msra.mxu1 %v739_v34 }
  0x82   :  { %399 = vmatprep.subr.bf16.mxu1 %v740_v35 }
  0x85   :  { %400 = vmatpush1.bf16.msra.mxu1 %v742_v36 }
  0x86   :  { %401 = vmatprep.subr.bf16.mxu1 %v743_v37 }
  0x89   :  { %402 = vmatpush1.bf16.msra.mxu1 %v745_v38 }
 0x125   :  { %v156_v58 = vpop.f32.mrb[0].mxu0 }
 0x126   :  { %v157_v59 = vadd.f32 %v156_v58, %v91_v56  ;;  %v158_v60 = vpop.f32.mrb[1].mxu0 }
 0x127   :  { %v159_v61 = vadd.f32 %v158_v60, %v95_v57  ;;  %v160_v62 = vpop.f32.mrb[2].mxu0 }
 0x128   :  { %v163_v63 = vmax.f32 %v157_v59, 0.0  ;;  %v161_v0 = vpop.f32.mrb[3].mxu0 }
 0x129   :  { %v164_v1 = vmax.f32 %v159_v61, 0.0 }
 0x12a   :  { %v165_v3 = vpack.c.bf16 %v163_v63, %v163_v63 }
 0x12b   :  { %v166_v2 = vpack.c.bf16 %v164_v1, %v164_v1 }
 0x12d   :  { %403 = vmatprep.mubr.bf16.mxu1 %v166_v2 }
 0x12e   :  { %404 = vmatmul.mubr.bf16.vlgmr.msra.gmra.mrb[0].mxu1 %v165_v3 }
 0x201   :  { %v405_v11 = vpop.f32.mrb[0].mxu1 }
 0x202   :  { %v406_v12 = vadd.f32 %v405_v11, %v204_v9  ;;  %v407_v13 = vpop.f32.mrb[1].mxu1 }
 0x203   :  { %v408_v14 = vadd.f32 %v407_v13, %v208_v10  ;;  %v409_v15 = vpop.f32.mrb[2].mxu1 }
 0x204   :  { %v412_v16 = vmax.f32 %v406_v12, 0.0  ;;  %v410_v17 = vpop.f32.mrb[3].mxu1 }
 0x205   :  { %v413_v18 = vmax.f32 %v408_v14, 0.0 }
 0x206   :  { %v414_v20 = vpack.c.bf16 %v412_v16, %v412_v16 }
 0x207   :  { %v415_v19 = vpack.c.bf16 %v413_v18, %v413_v18 }
 0x209   :  { %583 = vmatprep.mubr.bf16.mxu0 %v415_v19 }
 0x20a   :  { %584 = vmatmul.mubr.bf16.vlgmr.msra.gmra.mrb[4].mxu0 %v414_v20 }
 0x2dd   :  { %v677_v21 = vpop.f32.mrb[4].mxu0 }
 0x2de   :  { %v678_v23 = vpop.f32.mrb[5].mxu0 }
 0x2df   :  { %v679_v24 = vadd.f32 %v678_v23, %v677_v21  ;;  %v680_v25 = vpop.f32.mrb[6].mxu0 }
 0x2e0   :  { %v681_v26 = vpop.f32.mrb[7].mxu0 }
 0x2e1   :  { %v586_v27 = vadd.f32 %v679_v24, %v644_v22 }
 0x2e3   :  { %v593_v28 = vmax.f32 %v586_v27, -20.0 }
 0x2e5   :  { %v594_v29 = vmin.f32 %v593_v28, 2.0 }
 0x2e7   :  { %v595_v30 = vmul.f32 1.442695, %v594_v29 }
 0x2e9   :  { %762 = vpow2.f32 %v595_v30 }
 0x2f3   :  { %v763_v32 = vpop.eup %762 }
 0x2f4   :  { %v598_v33 = vsel %vm597_vm1, %v763_v32, %v586_v27 }
 0x2f5   :  { %599 = vst [vmem:[%s980_s7] sm:$0xff] %v598_v33 }
 0x2f6   :  { %604 = vsyncpa [#allocation3], 1 }
 0x2f7   :  { %605 = vsyncpa [#allocation5], 1 }
 0x2f8   :  { %606 = vsyncpa [#allocation8], 1 }

</bundles_post_ra>
